<compile_context>
chip_gen: v6e
topology: v6e:2x2x1
jax: 0.10.0
libtpu: 0.0.40
codegen_flags: <defaults>
</compile_context>

<pallas_src>
import jax
import jax.numpy as jnp
from jax.experimental import pallas as pl
from jax.experimental.pallas import tpu as pltpu

_LANE = 128


def cattention_kernel(x_ref, y_ref, scale_ref, bias_ref,
                      wct_x_ref, wct_y_ref, o_ref):
    # x_ref / y_ref / o_ref: (1, C, TS) blocks, TS on the lane axis.
    # scale_ref / bias_ref : (1, C, 1) per-batch blocks (constant over S-tiles).
    # wct_x_ref / wct_y_ref: (C, C) resident weights, bf16.
    x = x_ref[0]                                                   # (C, TS) f32
    y = y_ref[0]                                                   # (C, TS) f32

    # conv1(cat([x, y])) without bias:  out[o, s] = sum_i Wct[i, o] * cat[i, s]
    # bf16 operands, f32 accumulation (keeps the kernel HBM-bound on v5e too).
    conv = (jnp.dot(wct_x_ref[...], x.astype(jnp.bfloat16),
                    preferred_element_type=jnp.float32)
            + jnp.dot(wct_y_ref[...], y.astype(jnp.bfloat16),
                      preferred_element_type=jnp.float32))

    # out = x + gamma * (conv + b) * ww * x  ==  x * (bias + scale * conv)
    o_ref[0] = x * (bias_ref[0] + scale_ref[0] * conv)


def _pick_spatial_tile(S, N, ts_max):
    """Lane tile: multiple of 128, <= ts_max, sized so the grid pipelines."""
    s128 = pl.cdiv(S, _LANE) * _LANE
    # Aim for >= ~8 total grid steps (software pipelining) and >= 2 S-tiles so
    # both of v7x's TensorCores get work even when N == 1.
    target_tiles = max(2, pl.cdiv(8, N))
    ts = pl.cdiv(pl.cdiv(s128, target_tiles), _LANE) * _LANE
    return max(_LANE, min(ts, ts_max, s128))


def cattention_pallas(x, y, params, ts_max=1024):
    """x, y: (N, C, H, W) float32 (NCHW, as in PyTorch)."""
    N, C, H, W = x.shape
    S = H * W
    TS = _pick_spatial_tile(S, N, ts_max)
    grid_s = pl.cdiv(S, TS)          # ragged last tile handled by Pallas masking

    x2 = x.reshape(N, C, S)
    y2 = y.reshape(N, C, S)

    # ---- Channel-attention branch hoisted to the wrapper (O(N*C) work).
    # TODO(synk): nn.Dropout() is stochastic in train mode; implemented as
    # eval-mode identity.
    w1 = params["linear1_w"][:, :, 0, 0]                       # (C//6, C)
    w2 = params["linear2_w"][:, :, 0, 0]                       # (C, C//6)
    pooled = jnp.mean(y2, axis=-1)                             # (N, C)
    h = jnp.maximum(jnp.einsum('oc,nc->no', w1, pooled), 0.0)  # (N, C//6)
    ww = jnp.einsum('oc,nc->no', w2, h)                        # (N, C)
    gamma = params["gamma"].reshape(())
    scale = (gamma * ww)[:, :, None]                           # (N, C, 1)
    bias = 1.0 + scale * params["conv1_b"].reshape(1, C, 1)    # (N, C, 1)

    # ---- ConvTranspose2d weight: (in=2C, out=C, 1, 1); out[o]=sum_i W[i,o]*in[i]
    # Shipped as bf16: halves weight DMA, MXU runs bf16 x bf16 -> f32.
    wct_t = params["conv1_w"][:, :, 0, 0].T                    # (C, 2C), out-major
    wct_x = wct_t[:, :C].astype(jnp.bfloat16)                  # acts on x
    wct_y = wct_t[:, C:].astype(jnp.bfloat16)                  # acts on y

    # NOTE: for deployments where C is not a multiple of 8 (this demo's C=12),
    # padding C up to a multiple of 8 in the wrapper would un-mask the sublane
    # axis; real pysot C=256 already maps perfectly onto the MXU.

    out = pl.pallas_call(
        cattention_kernel,
        out_shape=jax.ShapeDtypeStruct((N, C, S), jnp.float32),
        grid_spec=pltpu.PrefetchScalarGridSpec(
            num_scalar_prefetch=0,
            grid=(N, grid_s),
            in_specs=[
                pl.BlockSpec((1, C, TS), lambda n, s: (n, 0, s)),   # x
                pl.BlockSpec((1, C, TS), lambda n, s: (n, 0, s)),   # y
                pl.BlockSpec((1, C, 1), lambda n, s: (n, 0, 0)),    # scale
                pl.BlockSpec((1, C, 1), lambda n, s: (n, 0, 0)),    # bias
                pl.BlockSpec((C, C), lambda n, s: (0, 0)),          # wct_x
                pl.BlockSpec((C, C), lambda n, s: (0, 0)),          # wct_y
            ],
            out_specs=pl.BlockSpec((1, C, TS), lambda n, s: (n, 0, s)),
        ),
        compiler_params=pltpu.CompilerParams(
            dimension_semantics=("parallel", "parallel")),
    )(x2, y2, scale, bias, wct_x, wct_y)

    return out.reshape(N, C, H, W)


def cattention_ref(x, y, params):
    """Pure-JAX reference mirroring the PyTorch forward (eval mode, f32)."""
    N, C, H, W = x.shape
    pooled = jnp.mean(y, axis=(2, 3), keepdims=True)                  # (N,C,1,1)
    w1 = params["linear1_w"][:, :, 0, 0]
    w2 = params["linear2_w"][:, :, 0, 0]
    h = jnp.maximum(jnp.einsum('oc,nchw->nohw', w1, pooled), 0.0)
    ww = jnp.einsum('oc,nchw->nohw', w2, h)                           # (N,C,1,1)
    cat = jnp.concatenate([x, y], axis=1)                             # (N,2C,H,W)
    wct = params["conv1_w"][:, :, 0, 0]                               # (2C, C)
    conv = (jnp.einsum('io,nihw->nohw', wct, cat)
            + params["conv1_b"].reshape(1, C, 1, 1))
    weight = conv * ww
    return x + params["gamma"].reshape(()) * weight * x


if __name__ == "__main__":
    # Small, in_dim divisible by 6 (linear1 has in_dim // 6 output channels).
    # H = W = 13 -> S = 169 (not a multiple of 128) exercises the ragged
    # last-S-tile (masked writeback) path that replaced the pad/slice copies.
    N, C, H, W = 2, 12, 13, 13

    key = jax.random.PRNGKey(0)
    k_x, k_y, k_ct, k_b, k_l1, k_l2 = jax.random.split(key, 6)

    x = jax.random.normal(k_x, (N, C, H, W), dtype=jnp.float32)
    y = jax.random.normal(k_y, (N, C, H, W), dtype=jnp.float32)

    params = {
        # ConvTranspose2d(in_dim*2, in_dim, 1, 1): weight (2C, C, 1, 1), bias (C,)
        "conv1_w": 0.1 * jax.random.normal(k_ct, (2 * C, C, 1, 1), dtype=jnp.float32),
        "conv1_b": 0.1 * jax.random.normal(k_b, (C,), dtype=jnp.float32),
        # Conv2d(C, C//6, 1, bias=False): weight (C//6, C, 1, 1)
        "linear1_w": 0.3 * jax.random.normal(k_l1, (C // 6, C, 1, 1), dtype=jnp.float32),
        # Conv2d(C//6, C, 1, bias=False): weight (C, C//6, 1, 1)
        "linear2_w": 0.3 * jax.random.normal(k_l2, (C, C // 6, 1, 1), dtype=jnp.float32),
        # gamma is nn.Parameter(zeros(1)) in __init__; set nonzero here so the
        # attention branch actually contributes (deterministic synthetic init).
        "gamma": jnp.full((1,), 1.0, dtype=jnp.float32),
    }

    out = cattention_pallas(x, y, params)
    out = jax.block_until_ready(out)

    ref = cattention_ref(x, y, params)
    assert out.shape == (N, C, H, W)
    err = jnp.max(jnp.abs(out - ref))
    # bf16 MXU operands (f32 accumulation) -> slightly looser tolerance than f32.
    assert jnp.allclose(out, ref, atol=2e-3, rtol=2e-3), f"max abs err = {err}"

    print("KERNEL_OK")
</pallas_src>

<mosaic_0001>
module attributes {stable_mosaic.version = 11 : i64} {
  func.func @cattention_kernel(%arg0: i32, %arg1: i32, %arg2: memref<1x12x128xf32, #tpu.memory_space<vmem>>, %arg3: memref<1x12x128xf32, #tpu.memory_space<vmem>>, %arg4: memref<1x12x1xf32, #tpu.memory_space<vmem>>, %arg5: memref<1x12x1xf32, #tpu.memory_space<vmem>>, %arg6: memref<12x12xbf16, #tpu.memory_space<vmem>>, %arg7: memref<12x12xbf16, #tpu.memory_space<vmem>>, %arg8: memref<1x12x128xf32, #tpu.memory_space<vmem>>) attributes {dimension_semantics = [#tpu.dimension_semantics<parallel>, #tpu.dimension_semantics<parallel>], iteration_bounds = array<i64: 2, 2>, scalar_prefetch = 0 : i64, scratch_operands = 0 : i64, tpu.core_type = #tpu.core_type<tc>, window_params = [{transform_indices = @transform_0, window_bounds = array<i64: 1, 12, 128>}, {transform_indices = @transform_1, window_bounds = array<i64: 1, 12, 128>}, {transform_indices = @transform_2, window_bounds = array<i64: 1, 12, 1>}, {transform_indices = @transform_3, window_bounds = array<i64: 1, 12, 1>}, {pipeline_mode = #tpu.pipeline_mode<synchronous>, transform_indices = @transform_4, window_bounds = array<i64: 12, 12>}, {pipeline_mode = #tpu.pipeline_mode<synchronous>, transform_indices = @transform_5, window_bounds = array<i64: 12, 12>}, {transform_indices = @transform_6, window_bounds = array<i64: 1, 12, 128>}]} {
    %c0 = arith.constant 0 : index
    %c0_0 = arith.constant 0 : index
    %c0_1 = arith.constant 0 : index
    %0 = vector.load %arg2[%c0, %c0_0, %c0_1] : memref<1x12x128xf32, #tpu.memory_space<vmem>>, vector<1x12x128xf32>
    %1 = vector.shape_cast %0 : vector<1x12x128xf32> to vector<12x128xf32>
    %c0_2 = arith.constant 0 : index
    %c0_3 = arith.constant 0 : index
    %c0_4 = arith.constant 0 : index
    %2 = vector.load %arg3[%c0_2, %c0_3, %c0_4] : memref<1x12x128xf32, #tpu.memory_space<vmem>>, vector<1x12x128xf32>
    %3 = vector.shape_cast %2 : vector<1x12x128xf32> to vector<12x128xf32>
    %c0_5 = arith.constant 0 : index
    %c0_6 = arith.constant 0 : index
    %4 = vector.load %arg6[%c0_5, %c0_6] : memref<12x12xbf16, #tpu.memory_space<vmem>>, vector<12x12xbf16>
    %5 = arith.truncf %1 : vector<12x128xf32> to vector<12x128xbf16>
    %cst = arith.constant dense<0.000000e+00> : vector<12x128xf32>
    %6 = tpu.matmul %4, %5, %cst {dimension_numbers = #tpu.dot_dimension_numbers<[1], [0], [0], [1], [0, 0, 1, 1], [], []>} : vector<12x12xbf16>, vector<12x128xbf16>, vector<12x128xf32> -> vector<12x128xf32>
    %c0_7 = arith.constant 0 : index
    %c0_8 = arith.constant 0 : index
    %7 = vector.load %arg7[%c0_7, %c0_8] : memref<12x12xbf16, #tpu.memory_space<vmem>>, vector<12x12xbf16>
    %8 = arith.truncf %3 : vector<12x128xf32> to vector<12x128xbf16>
    %cst_9 = arith.constant dense<0.000000e+00> : vector<12x128xf32>
    %9 = tpu.matmul %7, %8, %cst_9 {dimension_numbers = #tpu.dot_dimension_numbers<[1], [0], [0], [1], [0, 0, 1, 1], [], []>} : vector<12x12xbf16>, vector<12x128xbf16>, vector<12x128xf32> -> vector<12x128xf32>
    %10 = arith.addf %6, %9 : vector<12x128xf32>
    %c0_10 = arith.constant 0 : index
    %c0_11 = arith.constant 0 : index
    %c0_12 = arith.constant 0 : index
    %11 = vector.load %arg5[%c0_10, %c0_11, %c0_12] : memref<1x12x1xf32, #tpu.memory_space<vmem>>, vector<1x12x1xf32>
    %12 = vector.shape_cast %11 : vector<1x12x1xf32> to vector<12x1xf32>
    %c0_13 = arith.constant 0 : index
    %c0_14 = arith.constant 0 : index
    %c0_15 = arith.constant 0 : index
    %13 = vector.load %arg4[%c0_13, %c0_14, %c0_15] : memref<1x12x1xf32, #tpu.memory_space<vmem>>, vector<1x12x1xf32>
    %14 = vector.shape_cast %13 : vector<1x12x1xf32> to vector<12x1xf32>
    %15 = vector.broadcast %14 : vector<12x1xf32> to vector<12x128xf32>
    %16 = arith.mulf %15, %10 : vector<12x128xf32>
    %17 = vector.broadcast %12 : vector<12x1xf32> to vector<12x128xf32>
    %18 = arith.addf %17, %16 : vector<12x128xf32>
    %19 = arith.mulf %1, %18 : vector<12x128xf32>
    %c0_16 = arith.constant 0 : index
    %c0_17 = arith.constant 0 : index
    %c0_18 = arith.constant 0 : index
    %20 = vector.load %arg8[%c0_16, %c0_17, %c0_18] : memref<1x12x128xf32, #tpu.memory_space<vmem>>, vector<1x12x128xf32>
    %21 = vector.shape_cast %20 : vector<1x12x128xf32> to vector<12x128xf32>
    %22 = vector.shape_cast %19 : vector<12x128xf32> to vector<1x12x128xf32>
    tpu.vector_store %arg8[%c0_16, %c0_17, %c0_18], %22 {strides = array<i32>} : memref<1x12x128xf32, #tpu.memory_space<vmem>>, vector<1x12x128xf32>,
    return
  }
  func.func @transform_0(%arg0: i32, %arg1: i32) -> (i32, i32, i32) {
    %c0_i32 = arith.constant 0 : i32
    %c0_i32_0 = arith.constant 0 : i32
    return %arg0, %c0_i32, %arg1 : i32, i32, i32
  }
  func.func @transform_1(%arg0: i32, %arg1: i32) -> (i32, i32, i32) {
    %c0_i32 = arith.constant 0 : i32
    %c0_i32_0 = arith.constant 0 : i32
    return %arg0, %c0_i32, %arg1 : i32, i32, i32
  }
  func.func @transform_2(%arg0: i32, %arg1: i32) -> (i32, i32, i32) {
    %c0_i32 = arith.constant 0 : i32
    %c0_i32_0 = arith.constant 0 : i32
    %c0_i32_1 = arith.constant 0 : i32
    return %arg0, %c0_i32, %c0_i32_0 : i32, i32, i32
  }
  func.func @transform_3(%arg0: i32, %arg1: i32) -> (i32, i32, i32) {
    %c0_i32 = arith.constant 0 : i32
    %c0_i32_0 = arith.constant 0 : i32
    %c0_i32_1 = arith.constant 0 : i32
    return %arg0, %c0_i32, %c0_i32_0 : i32, i32, i32
  }
  func.func @transform_4(%arg0: i32, %arg1: i32) -> (i32, i32) {
    %c0_i32 = arith.constant 0 : i32
    %c0_i32_0 = arith.constant 0 : i32
    %c0_i32_1 = arith.constant 0 : i32
    return %c0_i32, %c0_i32_0 : i32, i32
  }
  func.func @transform_5(%arg0: i32, %arg1: i32) -> (i32, i32) {
    %c0_i32 = arith.constant 0 : i32
    %c0_i32_0 = arith.constant 0 : i32
    %c0_i32_1 = arith.constant 0 : i32
    return %c0_i32, %c0_i32_0 : i32, i32
  }
  func.func @transform_6(%arg0: i32, %arg1: i32) -> (i32, i32, i32) {
    %c0_i32 = arith.constant 0 : i32
    %c0_i32_0 = arith.constant 0 : i32
    return %arg0, %c0_i32, %arg1 : i32, i32, i32
  }
}

</mosaic_0001>

<bundles_post_ra>
// kernel: tpu_custom_call.1
= control target key start
LH: loop header
LB: loop body
LE: loop exit
PB: predicated region body
PF: predicated region fallthrough
CT: control target
= control target key end

     0   :  { %s921_s21 = smov 0   ;;  %s923_s22 = smov 0   ;;  %s1050_s0 = inlined_call_operand.vmem [shape: f32[2,12,169], index: 0, kind: input, shape index: {}]   ;;  %s1051_s1 = inlined_call_operand.vmem [shape: f32[2,12,169], index: 1, kind: input, shape index: {}]   ;;  %s1052_s2 = inlined_call_operand.vmem [shape: f32[2,12,1], index: 2, kind: input, shape index: {}]   ;;  %s1053_s3 = inlined_call_operand.vmem [shape: f32[2,12,1], index: 3, kind: input, shape index: {}]   ;;  %s1054_s4 = inlined_call_operand.vmem [shape: bf16[12,12], index: 4, kind: input, shape index: {}]   ;;  %s1055_s5 = inlined_call_operand.vmem [shape: bf16[12,12], index: 5, kind: input, shape index: {}]   ;;  %s1056_s6 = inlined_call_operand.vmem [shape: f32[2,12,169], index: 6, kind: output, shape index: {}]  }
   0x1   :  { %s925_s23 = smov 0   ;;  %s927_s24 = smov 0  }
   0x2   :  { %s929_s25 = smov 0   ;;  %s931_s26 = smov 0  }
   0x3   :  { %s933_s27 = smov 0  }
   0x4 LB: > { %s25_s28 = sadd.s32 1, %s873_s25  ;;  %s28_s29 = sadd.s32 1, %s877_s26  ;;  %s881_s27 = sphi %s933_s27, %s16_s27   ;;  %s877_s26 = sphi %s931_s26, %s1064_s26   ;;  %s873_s25 = sphi %s929_s25, %s1063_s25   ;;  %s869_s24 = sphi %s927_s24, %s1062_s24   ;;  %s865_s23 = sphi %s925_s23, %s1061_s23   ;;  %s861_s22 = sphi %s923_s22, %s1060_s22   ;;  %s857_s21 = sphi %s921_s21, %s1059_s21  }
   0x5   : > { %p26_p0 = scmp.ge.s32.totalorder %s25_s28, 2  ;;  %s719_s30 = sadd.s32 4294967295, %s881_s27  }
   0x6   : > { %p44_p1 = scmp.ne.s32.totalorder %s861_s22, %s857_s21  ;;  %p45_p2 = scmp.eq.s32.totalorder %s881_s27, 0 }
   0x7   : > { %s1066_s28 = smov (%p26_p0, %s25_s28), 0  ;;  %s1068_s29 = smov (!%p26_p0, %s28_s29), %s877_s26 }
   0x8   : > { %p30_p3 = scmp.ge.s32.totalorder %s1068_s29, 2  ;;  %p198_p4 = scmp.eq.s32.totalorder %s719_s30, 3 }
   0x9   : > { %s33_s7 = ssub.s32 %s873_s25, %s1066_s28  ;;  %p967_p5 = por %p45_p2, %p44_p1 }
   0xa   : > { %s1070_s29 = smov (%p30_p3, %s1068_s29), 0  ;;  %p973_p6 = por %p198_p4, %p44_p1 }
   0xb   : > { %s32_s10 = ssub.s32 %s877_s26, %s1070_s29  ;;  %s37_s12 = sadd.s32 1, %s861_s22 }
   0xc   : > { %s34_s11 = sor.u32 %s33_s7, %s32_s10  ;;  %p722_p8 = scmp.ge.s32.totalorder %s881_s27, 4 }
   0xd   : > { %p35_p7 = scmp.eq.s32.totalorder %s34_s11, 0 }
   0xe   : > { %226 = sbr.rel (%p722_p8) target bundleno = 33 (0x21), region = 24 }
   0xf   : > { %s981_s13 = scalar_select %p35_p7, %s861_s22, %s37_s12  }
  0x13   : > { %229 = sbr.rel (!%p967_p5) target bundleno = 26 (0x1a), region = 28  ;;  %s231_s14 = sand.u32 (%p967_p5), 1, %s861_s22  }
  0x14   : > { %s724_s15 = sshll.u32 (%p967_p5), %s877_s26, 2  ;;  %s723_s16 = sshll.u32 (%p967_p5), %s231_s14, 4 }
  0x15   : > { %s235_s17 = sadd.s32 (%p967_p5), %s873_s25, %s724_s15  ;;  %s233_s7 = scalar_lea.vmem (%p967_p5), [#allocation2], %s723_s16 }
  0x16   : > { %s725_s18 = sshll.u32 (%p967_p5), %s235_s17, 3 }
  0x17   : > { %s237_s30 = scalar_lea.vmem (%p967_p5), %s1050_s0, %s725_s18 }
  0x18   : > { %v268_v0 = vld [vmem:[%s237_s30] sm:$0xff]  ;;  %v270_v1 = vld [vmem:[%s237_s30 + $0x10] sm:$0xff] }
  0x19   : > { %269 = vst [vmem:[%s233_s7] sm:$0xff] %v268_v0  ;;  %271 = vst [vmem:[%s233_s7 + $0x8] sm:$0xff] %v270_v1 }
  0x1a PF: > { %277 = sbr.rel (!%p967_p5) target bundleno = 33 (0x21), region = 66  ;;  %s279_s10 = sand.u32 (%p967_p5), 1, %s861_s22  }
  0x1b   : > { %s727_s11 = sshll.u32 (%p967_p5), %s877_s26, 2  ;;  %s726_s12 = sshll.u32 (%p967_p5), %s279_s10, 4 }
  0x1c   : > { %s283_s14 = sadd.s32 (%p967_p5), %s873_s25, %s727_s11  ;;  %s281_s16 = scalar_lea.vmem (%p967_p5), [#allocation3], %s726_s12 }
  0x1d   : > { %s728_s15 = sshll.u32 (%p967_p5), %s283_s14, 3 }
  0x1e   : > { %s285_s18 = scalar_lea.vmem (%p967_p5), %s1051_s1, %s728_s15 }
  0x1f   : > { %v316_v2 = vld [vmem:[%s285_s18] sm:$0xff]  ;;  %v318_v3 = vld [vmem:[%s285_s18 + $0x10] sm:$0xff] }
  0x20   : > { %317 = vst [vmem:[%s281_s16] sm:$0xff] %v316_v2  ;;  %319 = vst [vmem:[%s281_s16 + $0x8] sm:$0xff] %v318_v3 }
  0x21 PF: > { %p729_p9 = scmp.ge.s32.totalorder %s881_s27, 1  ;;  %p340_p10 = scmp.lt.s32.totalorder %s881_s27, 5 }
  0x23   : > { %p341_p11 = pnand %p729_p9, %p340_p10 }
  0x24   : > { %s347_s8 = sand.u32 (!%p341_p11), 1, %s857_s21   ;;  %p396_p12 = scmp.lt.s32.totalorder (!%p341_p11), %s869_s24, 1 }
  0x25   : > { %344 = sbr.rel (%p341_p11) target bundleno = 264 (0x108), region = 112  ;;  %s1003_s20 = sshll.u32 (!%p341_p11), %s347_s8, 4 }
  0x26   : > { %s356_s30 = scalar_lea.vmem (!%p341_p11), [#allocation3], %s1003_s20  ;;  %s349_s7 = scalar_lea.vmem (!%p341_p11), [#allocation2], %s1003_s20 }
  0x2a   : > { %v883_v4 = vmov 0.0   ;;  %vm884_vm0 = vmmov 0   ;;  %v409_v5 = vld [vmem:[%s356_s30] sm:$0xff]  ;;  %v410_v6 = vld [vmem:[%s356_s30 + $0x8] sm:$0xf]  ;;  %vm426_vm1 = vcmask 1045504  }
  0x2b   : > { %752 = vmatprep.subr.bf16.mxu0 %v883_v4  ;;  %758 = vmatprep.subr.bf16.mxu1 %v883_v4  ;;  %v416_v7 = vpack.c.bf16 %v410_v6, %v409_v5  ;;  %v407_v8 = vld [vmem:[%s349_s7] sm:$0xff]  ;;  %v408_v9 = vld [vmem:[%s349_s7 + $0x8] sm:$0xf]  ;;  %v885_v11 = vmov 0   ;;  %s397_s11 = scalar_select %p396_p12, %s869_s24, 1  ;;  %vm422_vm2 = vcmask 97280  }
  0x2c   : > { %754 = vmatprep.mubr.msk.bf16.mxu0 %vm884_vm0, %v883_v4  ;;  %760 = vmatprep.mubr.msk.bf16.mxu1 %vm884_vm0, %v883_v4  ;;  %v413_v10 = vpack.c.bf16 %v408_v9, %v407_v8  ;;  %v825_v13 = vld [vmem:[%s1055_s5] sm:$0x3f]   ;;  %s395_s7 = scalar_lea.vmem [#allocation4], %s1003_s20  ;;  %s742_s21 = sshll.u32 (%p973_p6), %s869_s24, 2 }
  0x2d   : > { %823 = vset.pattern.permute.xlu0 %v885_v11  ;;  %824 = vset.pattern.permute.xlu1 %v885_v11  ;;  %v428_v12 = vsel %vm426_vm1, %v416_v7, 0  ;;  %v826_v15 = vld [vmem:[%s1054_s4] sm:$0x3f]   ;;  %s746_s15 = sshll.u32 %s397_s11, 4  ;;  %s563_s10 = sadd.s32 (%p973_p6), %s865_s23, %s742_s21 }
  0x2e   : > { %753 = vmatpush3.bf16.msra.mxu0 %v428_v12  ;;  %v480_v14 = vsel %vm426_vm1, %v413_v10, 0  ;;  %s400_s18 = scalar_lea.vmem %s1052_s2, %s746_s15  ;;  %s405_s30 = scalar_lea.vmem %s1053_s3, %s746_s15 }
  0x2f   : > { %759 = vmatpush3.bf16.msra.mxu1 %v480_v14  ;;  %v525_v16 = vld [vmem:[%s400_s18] sm:$0xff]  ;;  %v526_v18 = vld [vmem:[%s400_s18 + $0x8] sm:$0xf]  ;;  %s743_s11 = sshll.u32 (%p973_p6), %s563_s10, 3 }
  0x30   : > { %v523_v17 = vld [vmem:[%s405_s30] sm:$0xff]  ;;  %529 = vperm.xlu0 %823, %v525_v16   ;;  %v524_v19 = vld [vmem:[%s405_s30 + $0x8] sm:$0xf]  ;;  %s565_s15 = scalar_lea.vmem (%p973_p6), %s1056_s6, %s743_s11 }
  0x31   : > { %755 = vmatmul.mubr.msk.bf16.vlgmr.msra.gmra.mxu0 %vm422_vm2, %v825_v13  ;;  %541 = vperm.xlu1 %824, %v523_v17  }
  0x32   : > { %761 = vmatmul.mubr.msk.bf16.vlgmr.msra.gmra.mxu1 %vm422_vm2, %v826_v15 }
  0x34   : > { %534 = vperm.xlu0 %823, %v526_v18  }
  0x35   : > { %546 = vperm.xlu1 %824, %v524_v19  }
  0xab   : > { %v530_v21 = vpop.permute.xlu0 %529 }
  0xac   : > { %v542_v25 = vpop.permute.xlu1 %541 }
  0xaf   : > { %v535_v33 = vpop.permute.xlu0 %534 }
  0xb0   : > { %v547_v37 = vpop.permute.xlu1 %546 }
  0xf1   : > { %v464_v20 = vpop.f32.mrf.mxu0 }
  0xf2   : > { %v516_v22 = vpop.f32.mrf.mxu1 }
  0xf3   : > { %v517_v23 = vadd.f32 %v516_v22, %v464_v20  ;;  %v756_v24 = vpop.f32.mrf.mxu0 }
  0xf4   : > { %v762_v26 = vpop.f32.mrf.mxu1 }
  0xf5   : > { %v537_v27 = vmul.f32 %v530_v21, %v517_v23  ;;  %v467_v28 = vpop.f32.mrf.mxu0 }
  0xf6   : > { %v519_v29 = vpop.f32.mrf.mxu1 }
  0xf7   : > { %v549_v30 = vadd.f32 %v542_v25, %v537_v27  ;;  %v520_v31 = vadd.f32 %v519_v29, %v467_v28  ;;  %v757_v32 = vpop.f32.mrf.mxu0 }
  0xf8   : > { %v763_v34 = vpop.f32.mrf.mxu1 }
  0xf9   : > { %v551_v35 = vmul.f32 %v549_v30, %v407_v8  ;;  %v538_v36 = vmul.f32 %v535_v33, %v520_v31 }
  0xfb   : > { %553 = vst [vmem:[%s395_s7] sm:$0xff] %v551_v35  ;;  %v550_v38 = vadd.f32 %v547_v37, %v538_v36  ;;  %561 = sbr.rel (!%p973_p6) target bundleno = 264 (0x108), region = 124 }
  0xfd   : > { %v552_v39 = vmul.f32 %v550_v38, %v408_v9 }
  0xff   : > { %554 = vst [vmem:[%s395_s7 + $0x8] sm:$0xf] %v552_v39 }
 0x102   : > { %v596_v40 = vld [vmem:[%s395_s7] sm:$0xff] }
 0x103   : > { %597 = vst [vmem:[%s565_s15] sm:$0xff] %v596_v40 }
 0x106   : > { %v598_v41 = vld [vmem:[%s395_s7 + $0x8] sm:$0xff] }
 0x107   : > { %599 = vst [vmem:[%s565_s15 + $0x10] sm:$0xff] %v598_v41 }
 0x108 PF: > { %s16_s27 = sadd.s32 1, %s881_s27   ;;  %s1059_s21 = smov %s861_s22 }
 0x109   : > { %p13_p13 = scmp.ge.s32.totalorder %s16_s27, 6   ;;  %s1060_s22 = smov %s981_s13 }
 0x10a   : > { %s1061_s23 = smov %s873_s25  ;;  %s1062_s24 = smov %s877_s26 }
 0x10b   : > { %s1063_s25 = smov %s1066_s28  ;;  %s1064_s26 = smov %s1070_s29 }
 0x10c   :  { %15 = sbr.rel (!%p13_p13) target bundleno = 4 (0x4), region = 207 }

</bundles_post_ra>
